<compile_context>
chip_gen: v7x
topology: tpu7x:2x2x1
jax: 0.10.0
libtpu: 0.0.40
codegen_flags: <defaults>
</compile_context>

<pallas_src>
import jax
import jax.numpy as jnp
from jax.experimental import pallas as pl
from jax.experimental.pallas import tpu as pltpu

IN_DIM = 6
HID_DIM = 512
OUT_DIM = 3
OUT_LANES = 8      # compact lane width of the second matmul result
OUT_PAD = 128      # lane-dense padded output width

# Packed-parameter row layout (single (16, 512) f32 operand):
ROW_W1 = 0         # rows 0..5  : W1^T  (6, 512)
ROW_B1 = 6         # row  6     : b1    (512,)
ROW_B2 = 7         # row  7     : b2 in lanes 0..2, zeros elsewhere
ROW_W2 = 8         # rows 8..15 : W2 (3, 512) zero-padded to 8 rows (aligned tile group)
N_ROWS = 16


def policy_kernel(x_ref, p_ref, out_ref):
    # x_ref:  (B, 6) f32
    # p_ref:  (16, 512) f32 packed parameters (layout above)
    # out_ref:(B, 128) f32; lanes 0..2 real log-probs, lanes 3..127 = -inf
    B = x_ref.shape[0]
    x = x_ref[...]

    # Layer 1: Linear(6 -> 512) + ReLU (bias packed as row 6).
    h = jnp.dot(x, p_ref[ROW_W1:ROW_W1 + IN_DIM, :],
                preferred_element_type=jnp.float32)
    h = h + p_ref[ROW_B1:ROW_B1 + 1, :]
    h = jnp.maximum(h, 0.0)

    # Layer 2: Linear(512 -> 3).  W2 is stored row-major (3, 512) padded to
    # (8, 512), so contract as h @ W2^T -- keeps the 512 dim on lanes and the
    # HBM operand compact.
    w2 = p_ref[ROW_W2:ROW_W2 + OUT_LANES, :]                       # (8, 512)
    a = jnp.dot(h, w2.T, preferred_element_type=jnp.float32)       # (B, 8)
    a = a + p_ref[ROW_B2:ROW_B2 + 1, 0:OUT_LANES]                  # (1, 8) bias

    # log_softmax over dim=0 (batch axis), exactly as the PyTorch module.
    # Columns are independent, so the zero-padded columns 3..7 are harmless.
    m = jnp.max(a, axis=0, keepdims=True)
    z = a - m
    lse = jnp.log(jnp.sum(jnp.exp(z), axis=0, keepdims=True))
    lp = z - lse                                                    # (B, 8)

    # Mask the padding columns to -inf, then emit one lane-dense unmasked store.
    col = jax.lax.broadcasted_iota(jnp.int32, (B, OUT_LANES), 1)
    lp_masked = jnp.where(col < OUT_DIM, lp, -jnp.inf)
    fill = jnp.full((B, OUT_PAD - OUT_LANES), -jnp.inf, jnp.float32)
    out_ref[...] = jnp.concatenate([lp_masked, fill], axis=1)


def prepare_params(w1, b1, w2, b2):
    """One-time glue (call at init, NOT per forward).

    PyTorch-layout params -> single packed (16, 512) f32 operand."""
    p = jnp.zeros((N_ROWS, HID_DIM), jnp.float32)
    p = p.at[ROW_W1:ROW_W1 + IN_DIM, :].set(w1.T.astype(jnp.float32))    # rows 0..5
    p = p.at[ROW_B1, :].set(b1.astype(jnp.float32))                       # row 6
    p = p.at[ROW_B2, :OUT_DIM].set(b2.astype(jnp.float32))                # row 7, lanes 0..2
    p = p.at[ROW_W2:ROW_W2 + OUT_DIM, :].set(w2.astype(jnp.float32))      # rows 8..10
    return p


def _policy_call(x, params):
    B = x.shape[0]
    # Single-block VMEM residency; plenty of headroom up to B ~ 4096.
    assert B * HID_DIM * 4 <= 8 * 1024 * 1024, "use a gridded variant for huge B"
    vmem = pl.BlockSpec(memory_space=pltpu.MemorySpace.VMEM)
    cost = pl.CostEstimate(
        flops=2 * B * IN_DIM * HID_DIM + 2 * B * HID_DIM * OUT_LANES,
        transcendentals=B * OUT_LANES + OUT_LANES,
        bytes_accessed=(N_ROWS * HID_DIM + 8 * 128 + max(B, 8) * OUT_PAD) * 4,
    )
    return pl.pallas_call(
        policy_kernel,
        out_shape=jax.ShapeDtypeStruct((B, OUT_PAD), jnp.float32),
        in_specs=[vmem, vmem],
        out_specs=vmem,
        cost_estimate=cost,
    )(x, params)


# Padded (B, 128) slab: use this when fusing a downstream consumer (argmax /
# categorical sample); pad lanes are -inf so it is directly consumable.
policy_forward_padded = jax.jit(_policy_call)


@jax.jit
def policy_forward(x, params):
    """x: (B, 6) f32; params from prepare_params(). Returns (B, 3) log-probs."""
    return _policy_call(x, params)[:, :OUT_DIM]


def _reference(x, w1, b1, w2, b2):
    h = jnp.maximum(x @ w1.T + b1, 0.0)
    a = h @ w2.T + b2
    return jax.nn.log_softmax(a, axis=0)  # dim=0, matching the PyTorch code


if __name__ == "__main__":
    key = jax.random.PRNGKey(0)
    k_x, k_w1, k_b1, k_w2, k_b2 = jax.random.split(key, 5)

    B = 2

    # Deterministic parameter init, PyTorch nn.Linear-style uniform(-1/sqrt(fan_in), +).
    bound1 = 1.0 / jnp.sqrt(jnp.float32(IN_DIM))
    bound2 = 1.0 / jnp.sqrt(jnp.float32(HID_DIM))
    w1 = jax.random.uniform(k_w1, (HID_DIM, IN_DIM), jnp.float32, -bound1, bound1)
    b1 = jax.random.uniform(k_b1, (HID_DIM,), jnp.float32, -bound1, bound1)
    w2 = jax.random.uniform(k_w2, (OUT_DIM, HID_DIM), jnp.float32, -bound2, bound2)
    b2 = jax.random.uniform(k_b2, (OUT_DIM,), jnp.float32, -bound2, bound2)

    x = jax.random.normal(k_x, (B, IN_DIM), jnp.float32)

    # One-time parameter packing (hoisted out of the forward path).
    params = prepare_params(w1, b1, w2, b2)

    out = jax.block_until_ready(policy_forward(x, params))

    ref = _reference(x, w1, b1, w2, b2)
    assert out.shape == (B, OUT_DIM)
    assert jnp.allclose(out, ref, atol=1e-5, rtol=1e-5), "mismatch vs reference"

    # Padded slab sanity: real lanes match, pad lanes are -inf (safe for argmax).
    out_pad = jax.block_until_ready(policy_forward_padded(x, params))
    assert out_pad.shape == (B, OUT_PAD)
    assert jnp.allclose(out_pad[:, :OUT_DIM], ref, atol=1e-5, rtol=1e-5)
    assert bool(jnp.all(jnp.isneginf(out_pad[:, OUT_DIM:])))

    print("KERNEL_OK")
</pallas_src>

<mosaic_0001>
module attributes {stable_mosaic.version = 11 : i64} {
  func.func @policy_kernel(%arg0: memref<2x6xf32, #tpu.memory_space<vmem>>, %arg1: memref<16x512xf32, #tpu.memory_space<vmem>>, %arg2: memref<2x128xf32, #tpu.memory_space<vmem>>) attributes {dimension_semantics = [], scalar_prefetch = 0 : i64, scratch_operands = 0 : i64, tpu.core_type = #tpu.core_type<tc>} {
    %c0 = arith.constant 0 : index
    %c0_0 = arith.constant 0 : index
    %0 = vector.load %arg0[%c0, %c0_0] : memref<2x6xf32, #tpu.memory_space<vmem>>, vector<2x6xf32>
    %c0_1 = arith.constant 0 : index
    %c0_2 = arith.constant 0 : index
    %1 = vector.load %arg1[%c0_1, %c0_2] : memref<16x512xf32, #tpu.memory_space<vmem>>, vector<6x512xf32>
    %cst = arith.constant dense<0.000000e+00> : vector<2x512xf32>
    %2 = tpu.matmul %0, %1, %cst {dimension_numbers = #tpu.dot_dimension_numbers<[1], [0], [0], [1], [0, 0, 1, 1], [], []>} : vector<2x6xf32>, vector<6x512xf32>, vector<2x512xf32> -> vector<2x512xf32>
    %c6 = arith.constant 6 : index
    %c0_3 = arith.constant 0 : index
    %3 = vector.load %arg1[%c6, %c0_3] : memref<16x512xf32, #tpu.memory_space<vmem>>, vector<1x512xf32>
    %4 = vector.broadcast %3 : vector<1x512xf32> to vector<2x512xf32>
    %5 = arith.addf %2, %4 : vector<2x512xf32>
    %cst_4 = arith.constant 0.000000e+00 : f32
    %6 = vector.broadcast %cst_4 : f32 to vector<2x512xf32>
    %7 = arith.maximumf %5, %6 : vector<2x512xf32>
    %c8 = arith.constant 8 : index
    %c0_5 = arith.constant 0 : index
    %8 = vector.load %arg1[%c8, %c0_5] : memref<16x512xf32, #tpu.memory_space<vmem>>, vector<8x512xf32>
    %9 = tpu.transpose %8, [1, 0] : vector<8x512xf32> -> vector<512x8xf32>
    %cst_6 = arith.constant dense<0.000000e+00> : vector<2x8xf32>
    %10 = tpu.matmul %7, %9, %cst_6 {dimension_numbers = #tpu.dot_dimension_numbers<[1], [0], [0], [1], [0, 0, 1, 1], [], []>} : vector<2x512xf32>, vector<512x8xf32>, vector<2x8xf32> -> vector<2x8xf32>
    %c7 = arith.constant 7 : index
    %c0_7 = arith.constant 0 : index
    %11 = vector.load %arg1[%c7, %c0_7] : memref<16x512xf32, #tpu.memory_space<vmem>>, vector<1x8xf32>
    %12 = vector.broadcast %11 : vector<1x8xf32> to vector<2x8xf32>
    %13 = arith.addf %10, %12 : vector<2x8xf32>
    %cst_8 = arith.constant dense<0xFF800000> : vector<8xf32>
    %14 = vector.multi_reduction <maximumf>, %13, %cst_8 [0] : vector<2x8xf32> to vector<8xf32>
    %15 = vector.shape_cast %14 : vector<8xf32> to vector<1x8xf32>
    %16 = vector.broadcast %15 : vector<1x8xf32> to vector<2x8xf32>
    %17 = arith.subf %13, %16 : vector<2x8xf32>
    %18 = math.exp %17 : vector<2x8xf32>
    %cst_9 = arith.constant dense<0.000000e+00> : vector<8xf32>
    %19 = vector.multi_reduction <add>, %18, %cst_9 [0] : vector<2x8xf32> to vector<8xf32>
    %20 = vector.shape_cast %19 : vector<8xf32> to vector<1x8xf32>
    %21 = math.log %20 : vector<1x8xf32>
    %22 = vector.broadcast %21 : vector<1x8xf32> to vector<2x8xf32>
    %23 = arith.subf %17, %22 : vector<2x8xf32>
    %24 = tpu.iota {dimensions = array<i32: 1>} : vector<2x8xi32>
    %c3_i32 = arith.constant 3 : i32
    %25 = vector.broadcast %c3_i32 : i32 to vector<2x8xi32>
    %26 = arith.cmpi slt, %24, %25 : vector<2x8xi32>
    %cst_10 = arith.constant 0xFF800000 : f32
    %27 = vector.broadcast %cst_10 : f32 to vector<2x8xf32>
    %28 = arith.select %26, %23, %27 : vector<2x8xi1>, vector<2x8xf32>
    %cst_11 = arith.constant 0xFF800000 : f32
    %29 = vector.broadcast %cst_11 : f32 to vector<2x120xf32>
    %30 = tpu.concatenate %28, %29 in 1 : vector<2x8xf32>, vector<2x120xf32> -> vector<2x128xf32>
    %c0_12 = arith.constant 0 : index
    %c0_13 = arith.constant 0 : index
    %31 = vector.load %arg2[%c0_12, %c0_13] : memref<2x128xf32, #tpu.memory_space<vmem>>, vector<2x128xf32>
    tpu.vector_store %arg2[%c0_12, %c0_13], %30 {strides = array<i32>} : memref<2x128xf32, #tpu.memory_space<vmem>>, vector<2x128xf32>,
    return
  }
}

</mosaic_0001>

<bundles_post_ra>
// kernel: policy_forward.1
= control target key start
LH: loop header
LB: loop body
LE: loop exit
PB: predicated region body
PF: predicated region fallthrough
CT: control target
= control target key end

     0   :  { %7 = vsyncpa [#allocation3], 0  ;;  %s572_s0 = inlined_call_operand.hbm [shape: f32[2,6], index: 0, kind: input, shape index: {}]   ;;  %s573_s1 = inlined_call_operand.hbm [shape: f32[16,512], index: 1, kind: input, shape index: {}]   ;;  %s574_s2 = inlined_call_operand.hbm [shape: f32[2,128], index: 2, kind: output, shape index: {}]  }
   0x1   :  { %8 = vsyncpa [#allocation6], 0 }
   0x2   :  { %9 = vsyncpa [#allocation4], 0  ;;  %s508_s9 = smov [#allocation2]   ;;  %s509_s11 = smov [#allocation5]  }
   0x3   :  { %s16_s10 = sshll.u32 %s508_s9, 4  ;;  %s25_s12 = sshll.u32 %s509_s11, 4  ;;  %s17_s10 = int_to_ptr.vmem [resolvable:$true] %s16_s10  ;;  %s529_s12 = int_to_ptr.vmem [resolvable:$true] %s25_s12 }
   0x4   :  { %s436_s15 = scalar_lea.hbm %s572_s0, 32 }
   0x5   :  { %p437_p0 = scmp.ne.s32.totalorder %s572_s0, %s436_s15  ;;  %p440_p1 = scmp.lt.u32.totalorder %s436_s15, %s572_s0 }
   0x7   :  { %p442_p2 = pnand %p440_p1, %p437_p0 }
   0x9   :  { %445 = shalt.err (!%p442_p2)
}
   0xa   :  { %s446_s20 = scalar_lea.vmem %s17_s10, 32  ;;  %p451_p4 = scmp.lt.s32.totalorder %s17_s10, %s17_s10 }
   0xb   :  { %p447_p3 = scmp.ne.s32.totalorder %s17_s10, %s446_s20  ;;  %p452_p5 = scmp.lt.s32.totalorder %s446_s20, %s446_s20 }
   0xd   :  { %p453_p6 = por %p452_p5, %p451_p4 }
   0xf   :  { %p454_p7 = pnand %p453_p6, %p447_p3 }
  0x11   :  { %457 = shalt.err (!%p454_p7)
}
  0x12   :  { %19 = dma.hbm_to_vmem [thread:$0]  %s572_s0, 32, %s17_s10, [#allocation3]  }
  0x13   :  { %s458_s25 = scalar_lea.hbm %s573_s1, 1024 }
  0x14   :  { %p459_p8 = scmp.ne.s32.totalorder %s573_s1, %s458_s25  ;;  %p462_p9 = scmp.lt.u32.totalorder %s458_s25, %s573_s1 }
  0x16   :  { %p464_p10 = pnand %p462_p9, %p459_p8 }
  0x18   :  { %467 = shalt.err (!%p464_p10)
}
  0x19   :  { %s468_s30 = scalar_lea.vmem %s529_s12, 1024  ;;  %p473_p12 = scmp.lt.s32.totalorder %s529_s12, %s529_s12 }
  0x1a   :  { %p469_p11 = scmp.ne.s32.totalorder %s529_s12, %s468_s30  ;;  %p474_p13 = scmp.lt.s32.totalorder %s468_s30, %s468_s30 }
  0x1c   :  { %p475_p0 = por %p474_p13, %p473_p12 }
  0x1e   :  { %p476_p1 = pnand %p475_p0, %p469_p11 }
  0x20   :  { %479 = shalt.err (!%p476_p1)
}
  0x21   :  { %s510_s0 = smov 512   ;;  %s511_s3 = smov 32  }
  0x22   :  { %31 = dma.hbm_to_vmem [thread:$0]  %s573_s1, 1024, %s529_s12, [#allocation6], %s510_s0, %s510_s0, %s511_s3  }
  0x23   :  { %502 = dma.done.wait [#allocation3], 32  }
  0x24   :  { %503 = vsyncadd [#allocation3], 4294967264 }
  0x25   :  { %504 = dma.done.wait [#allocation6], 1024  }
  0x26   :  { %505 = vsyncadd [#allocation6], 4294966272  ;;  %v512_v0 = vmov 0.0   ;;  %vm70_vm0 = vcmask 1045504   ;;  %vm66_vm1 = vcmask 48128   ;;  %v230_v6 = vld [vmem:[#allocation5 + $0x28] sm:$0xff]  ;;  %v46_v10 = vlaneseq }
  0x27   :  { %147 = vmatprep.mubr.f32.mxu0 %v512_v0  ;;  %218 = vmatprep.mubr.f32.mxu1 %v512_v0  ;;  %v40_v1 = vld [vmem:[#allocation5 + $0x8] sm:$0x3f]  ;;  %v42_v2 = vld [vmem:[#allocation5 + $0x18] sm:$0x3f]  ;;  %v39_v3 = vld [vmem:[#allocation5] sm:$0x3f] }
  0x28   :  { %418 = vmatprep.subr.msk.mxu0 %vm70_vm0, %v40_v1  ;;  %421 = vmatprep.subr.msk.mxu1 %vm70_vm0, %v42_v2  ;;  %v41_v4 = vld [vmem:[#allocation5 + $0x10] sm:$0x3f]  ;;  %v38_v5 = vld [vmem:[#allocation2] sm:$0x3]  ;;  %v229_v8 = vld [vmem:[#allocation5 + $0x20] sm:$0xff]  ;;  %v47_v11 = vshrl.u32 %v46_v10, 7 }
  0x29   :  { %419 = vmatpush1.msk.msra.mxu0 %vm70_vm0, %v39_v3  ;;  %422 = vmatpush1.msk.msra.mxu1 %vm70_vm0, %v41_v4  ;;  %v232_v7 = vld [vmem:[#allocation5 + $0x38] sm:$0xff]  ;;  %v231_v9 = vld [vmem:[#allocation5 + $0x30] sm:$0xff]  ;;  %v233_v33 = vld [vmem:[#allocation5 + $0x7] ss:$0 sm:$0xff]  ;;  %vm374_vm2 = vcmask 58368   ;;  %v396_v57 = vand.u32 127, %v46_v10 }
  0x2a   :  { %420 = vmatmul.mubr.msk.f32.vlgmr.msra.gmra.mrb[0].mxu0 %vm66_vm1, %v38_v5  ;;  %423 = vmatmul.mubr.msk.f32.vlgmr.msra.gmra.mrb[0].mxu1 %vm66_vm1, %v38_v5  ;;  %v48_v12 = vsub.s32 0, %v47_v11  ;;  %v56_v13 = vsub.s32 2, %v47_v11  ;;  %v44_v14 = vld [vmem:[#allocation5 + $0x6] ss:$8 sm:$0xf]  ;;  %v52_v15 = vsub.s32 1, %v47_v11 }
  0x2b   :  { %234 = vmatprep.subr.mxu1 %v230_v6  ;;  %304 = vmatprep.subr.mxu0 %v232_v7  ;;  %v60_v16 = vsub.s32 3, %v47_v11  ;;  %vm397_vm3 = vcmp.lt.s32.totalorder %v396_v57, 3  ;;  %s513_s1 = smov [#allocation7]   ;;  %vm399_vm4 = vcmask 64512  }
  0x2c   :  { %v49_v17 = vrot.slane %v44_v14, %v48_v12  ;;  %v57_v18 = vrot.slane %v44_v14, %v56_v13  ;;  %v53_v19 = vrot.slane %v44_v14, %v52_v15  ;;  %s408_s6 = sshll.u32 %s513_s1, 4  ;;  %s409_s6 = int_to_ptr.vmem [resolvable:$true] %s408_s6 }
  0x2d   :  { %v61_v20 = vrot.slane %v44_v14, %v60_v16  ;;  %s480_s7 = scalar_lea.vmem %s409_s6, 32  ;;  %p485_p3 = scmp.lt.s32.totalorder %s409_s6, %s409_s6 }
  0x2e   :  { %p481_p2 = scmp.ne.s32.totalorder %s409_s6, %s480_s7  ;;  %p486_p4 = scmp.lt.s32.totalorder %s480_s7, %s480_s7 }
  0x30   :  { %235 = vmatpush1.xpose.msra.mxu1 %v229_v8  ;;  %305 = vmatpush1.xpose.msra.mxu0 %v231_v9  ;;  %p487_p5 = por %p486_p4, %p485_p3 }
  0x32   :  { %p488_p6 = pnand %p487_p5, %p481_p2 }
  0xfd   :  { %v149_v21 = vpop.f32.mrb[0].mxu0  ;;  %v220_v22 = vpop.f32.mrb[0].mxu1 }
  0xfe   :  { %v150_v23 = vadd.f32 %v149_v21, %v49_v17  ;;  %v221_v24 = vadd.f32 %v220_v22, %v57_v18  ;;  %v151_v25 = vpop.f32.mrb[1].mxu0  ;;  %v222_v26 = vpop.f32.mrb[1].mxu1 }
  0xff   :  { %v152_v27 = vadd.f32 %v151_v25, %v53_v19  ;;  %v223_v28 = vadd.f32 %v222_v26, %v61_v20 }
 0x100   :  { %v227_v29 = vmax.f32 %v221_v24, 0.0  ;;  %v225_v32 = vmax.f32 %v150_v23, 0.0 }
 0x101   :  { %v226_v30 = vmax.f32 %v152_v27, 0.0  ;;  %v228_v31 = vmax.f32 %v223_v28, 0.0 }
 0x103   :  { %298 = vmatprep.mubr.f32.mxu1 %v226_v30  ;;  %368 = vmatprep.mubr.f32.mxu0 %v228_v31 }
 0x104   :  { %299 = vmatmul.mubr.f32.vlgmr.msra.gmra.mrb[2].mxu1 %v225_v32  ;;  %369 = vmatmul.mubr.f32.vlgmr.msra.gmra.mrb[2].mxu0 %v227_v29 }
 0x1d7   :  { %v300_v34 = vpop.f32.mrb[2].mxu1  ;;  %v370_v35 = vpop.f32.mrb[2].mxu0 }
 0x1d8   :  { %v301_v36 = vadd.f32 %v300_v34, %v233_v33  ;;  %v302_v37 = vpop.f32.mrb[3].mxu1  ;;  %v372_v38 = vpop.f32.mrb[3].mxu0 }
 0x1da   :  { %v371_v39 = vadd.f32 %v370_v35, %v301_v36 }
 0x1dc   :  { %v375_v40 = vsel %vm374_vm2, %v371_v39, -inf }
 0x1dd   :  { %v376_v41 = vrot.slane %v375_v40, 4 }
 0x1df   :  { %v377_v42 = vmax.f32 %v375_v40, %v376_v41 }
 0x1e1   :  { %v378_v43 = vrot.slane %v377_v42, 2 }
 0x1e3   :  { %v379_v44 = vmax.f32 %v377_v42, %v378_v43 }
 0x1e5   :  { %v380_v45 = vrot.slane %v379_v44, 1 }
 0x1e7   :  { %v381_v46 = vmax.f32 %v379_v44, %v380_v45 }
 0x1e9   :  { %v382_v47 = vsub.f32 %v371_v39, %v381_v46 }
 0x1eb   :  { %v383_v48 = vmul.f32 1.442695, %v382_v47 }
 0x1ed   :  { %432 = vpow2.f32 %v383_v48 }
 0x1f7   :  { %v433_v49 = vpop.eup %432 }
 0x1f8   :  { %v385_v50 = vsel %vm374_vm2, %v433_v49, 0.0 }
 0x1f9   :  { %v386_v51 = vrot.slane %v385_v50, 4 }
 0x1fb   :  { %v387_v52 = vadd.f32 %v386_v51, %v385_v50 }
 0x1fd   :  { %v388_v53 = vrot.slane %v387_v52, 2 }
 0x1ff   :  { %v389_v54 = vadd.f32 %v388_v53, %v387_v52 }
 0x201   :  { %v390_v55 = vrot.slane %v389_v54, 1 }
 0x203   :  { %v391_v56 = vadd.f32 %v390_v55, %v389_v54 }
 0x205   :  { %434 = vlog2.f32 %v391_v56 }
 0x20f   :  { %v435_v58 = vpop.eup %434 }
 0x210   :  { %v393_v59 = vmul.f32 0.6931472, %v435_v58 }
 0x212   :  { %v394_v60 = vsub.f32 %v382_v47, %v393_v59 }
 0x214   :  { %v398_v61 = vsel %vm397_vm3, %v394_v60, -inf }
 0x215   :  { %v400_v62 = vsel %vm399_vm4, %v398_v61, -inf }
 0x216   :  { %401 = vst [vmem:[#allocation7] sm:$0x3] %v400_v62 }
 0x217   :  { %491 = shalt.err (!%p488_p6)
}
 0x218   :  { %s492_s10 = scalar_lea.hbm %s574_s2, 32 }
 0x219   :  { %p493_p7 = scmp.ne.s32.totalorder %s574_s2, %s492_s10  ;;  %p496_p8 = scmp.lt.u32.totalorder %s492_s10, %s574_s2 }
 0x21b   :  { %p498_p9 = pnand %p496_p8, %p493_p7 }
 0x21d   :  { %501 = shalt.err (!%p498_p9)
}
 0x21e   :  { %411 = dma.vmem_to_hbm [thread:$0]  %s409_s6, 32, %s574_s2, [#allocation4]  }
 0x21f   :  { %506 = dma.done.wait [#allocation4], 32  }
 0x220   :  { %507 = vsyncadd [#allocation4], 4294967264 }
 0x221   :  { %415 = vsyncpa [#allocation3], 1 }
 0x222   :  { %416 = vsyncpa [#allocation6], 1 }
 0x223   :  { %417 = vsyncpa [#allocation4], 1 }

</bundles_post_ra>
